<compile_context>
chip_gen: v6e
topology: v6e:2x2x1
jax: 0.10.0
libtpu: 0.0.40
codegen_flags: <defaults>
</compile_context>

<pallas_src>
import functools
import operator

import jax
import jax.numpy as jnp
from jax.experimental import pallas as pl
from jax.experimental.pallas import tpu as pltpu

# ---- problem sizes (consistent with the module) ----
B = 2            # batch
C = 32           # hidden_channels
L = 16           # backcast_length (conv sequence length)
M = B * L        # rows fed to the MXU (batch folded into M)
N_LAYERS = 4     # conv1d_1..conv1d_4
K = 3            # conv kernel size


def block_kernel(x_ref, w_ref, b_ref, o_ref):
    """Fused 4x (Conv1d(k=3, pad=1) + ReLU), channels-last, batch folded into rows.

    x_ref : (M, C)             f32   activations, M = B*L
    w_ref : (N_LAYERS, 3C, C)  bf16  fused-tap weights, rows ordered [k=0 | k=1 | k=2] x c_in
    b_ref : (N_LAYERS, 1, C)   f32   biases
    o_ref : (M, C)             f32
    """
    x = x_ref[...]  # (M, C) f32

    # Boundary masks for the +/-1 shifts, hoisted out of the layer loop.
    # They enforce padding=1 semantics AND prevent cross-batch leakage of the fold.
    row = jax.lax.broadcasted_iota(jnp.int32, (M, C), 0)
    seq_start = functools.reduce(operator.or_, [row == b * L for b in range(B)])
    seq_end = functools.reduce(operator.or_, [row == b * L + (L - 1) for b in range(B)])

    for layer in range(N_LAYERS):
        # x[l-1] / x[l+1] via XLU rolls (sublane axis) + boundary masking.
        x_prev = jnp.where(seq_start, 0.0, pltpu.roll(x, 1, axis=0))
        x_next = jnp.where(seq_end, 0.0, pltpu.roll(x, M - 1, axis=0))  # == roll(x, -1)

        # Fuse the 3 taps into a single K=3C matmul: (M, 3C) @ (3C, C) on the MXU.
        x_cat = jnp.concatenate([x_prev, x, x_next], axis=1).astype(jnp.bfloat16)
        y = jnp.dot(x_cat, w_ref[layer], preferred_element_type=jnp.float32)
        x = jnp.maximum(y + b_ref[layer], 0.0)  # bias + ReLU in f32

    o_ref[...] = x.astype(o_ref.dtype)

    # TODO(synk): theta_b_fc/theta_f_fc and backcast/forecast projections exist on the
    # module but are NOT used by Block.forward, so they are intentionally not fused here.


@jax.jit
def block_forward_nlc(x_nlc, w_cat, b_stack):
    """x_nlc: (B, L, C) f32 channels-last. Returns (B, L, C) f32."""
    x2d = x_nlc.reshape(M, C)  # contiguous merge of (B, L) -> free (no data movement)
    flops = 2 * N_LAYERS * M * (K * C) * C
    bytes_accessed = x2d.size * 4 + w_cat.size * 2 + b_stack.size * 4 + M * C * 4
    out2d = pl.pallas_call(
        block_kernel,
        out_shape=jax.ShapeDtypeStruct((M, C), jnp.float32),
        in_specs=[
            pl.BlockSpec(memory_space=pltpu.MemorySpace.VMEM),  # x  (whole array)
            pl.BlockSpec(memory_space=pltpu.MemorySpace.VMEM),  # fused weights
            pl.BlockSpec(memory_space=pltpu.MemorySpace.VMEM),  # biases
        ],
        out_specs=pl.BlockSpec(memory_space=pltpu.MemorySpace.VMEM),
        cost_estimate=pl.CostEstimate(
            flops=flops, transcendentals=0, bytes_accessed=bytes_accessed),
    )(x2d, w_cat, b_stack)
    return out2d.reshape(B, L, C)


def make_params(key):
    """Deterministic PyTorch-layout params: w (C_out, C_in, 3), b (C,)."""
    ws, bs = [], []
    for _ in range(N_LAYERS):
        kw, kb, key = jax.random.split(key, 3)
        ws.append(jax.random.normal(kw, (C, C, K), jnp.float32) * 0.1)
        bs.append(jax.random.normal(kb, (C,), jnp.float32) * 0.1)
    return ws, bs


def pack_params(ws, bs):
    """Kernel layout: per layer (3C, C) with rows ordered [tap k][c_in], cols = c_out."""
    w_cat = jnp.stack(
        [jnp.transpose(w, (2, 1, 0)).reshape(K * C, C) for w in ws], axis=0
    ).astype(jnp.bfloat16)                        # (N_LAYERS, 3C, C) bf16
    b_stack = jnp.stack(bs, axis=0)[:, None, :]   # (N_LAYERS, 1, C)  f32
    return w_cat, b_stack


def ref_forward(x_ncl, ws, bs):
    """Pure-JAX f32 reference identical to the PyTorch module (NCL, OIH weights)."""
    y = x_ncl
    for w, b in zip(ws, bs):
        y = jax.lax.conv_general_dilated(
            y, w, window_strides=(1,), padding=((1, 1),),
            dimension_numbers=("NCH", "OIH", "NCH"))
        y = jax.nn.relu(y + b[None, :, None])
    return y


if __name__ == "__main__":
    key = jax.random.PRNGKey(0)
    kx, kp = jax.random.split(key)
    ws, bs = make_params(kp)
    w_cat, b_stack = pack_params(ws, bs)

    # Module-layout input (PyTorch NCL). The kernel boundary is channels-last NLC;
    # in a real N-BEATS stack activations stay NLC between blocks, so the transpose
    # below is harness-only layout prep, not part of the kernel path.
    x_ncl = jax.random.normal(kx, (B, C, L), jnp.float32)
    x_nlc = jnp.transpose(x_ncl, (0, 2, 1))

    out_nlc = jax.block_until_ready(block_forward_nlc(x_nlc, w_cat, b_stack))
    out_ncl = jnp.transpose(out_nlc, (0, 2, 1))

    ref = jax.block_until_ready(ref_forward(x_ncl, ws, bs))
    assert out_ncl.shape == (B, C, L)
    max_err = float(jnp.max(jnp.abs(out_ncl - ref)))
    # bf16 MXU operands -> looser tolerance than the pure-f32 1e-4 of the old kernel.
    assert jnp.allclose(out_ncl, ref, atol=5e-2, rtol=5e-2), (
        f"mismatch vs conv reference, max_err={max_err}")

    print("KERNEL_OK")
</pallas_src>

<mosaic_0001>
module attributes {stable_mosaic.version = 11 : i64} {
  func.func @block_kernel(%arg0: memref<32x32xf32, #tpu.memory_space<vmem>>, %arg1: memref<4x96x32xbf16, #tpu.memory_space<vmem>>, %arg2: memref<4x1x32xf32, #tpu.memory_space<vmem>>, %arg3: memref<32x32xf32, #tpu.memory_space<vmem>>) attributes {dimension_semantics = [], scalar_prefetch = 0 : i64, scratch_operands = 0 : i64, tpu.core_type = #tpu.core_type<tc>} {
    %c0 = arith.constant 0 : index
    %c0_0 = arith.constant 0 : index
    %0 = vector.load %arg0[%c0, %c0_0] : memref<32x32xf32, #tpu.memory_space<vmem>>, vector<32x32xf32>
    %1 = tpu.iota {dimensions = array<i32: 0>} : vector<32x32xi32>
    %c0_i32 = arith.constant 0 : i32
    %2 = vector.broadcast %c0_i32 : i32 to vector<32x32xi32>
    %3 = arith.cmpi eq, %1, %2 : vector<32x32xi32>
    %c16_i32 = arith.constant 16 : i32
    %4 = vector.broadcast %c16_i32 : i32 to vector<32x32xi32>
    %5 = arith.cmpi eq, %1, %4 : vector<32x32xi32>
    %6 = arith.ori %3, %5 : vector<32x32xi1>
    %c15_i32 = arith.constant 15 : i32
    %7 = vector.broadcast %c15_i32 : i32 to vector<32x32xi32>
    %8 = arith.cmpi eq, %1, %7 : vector<32x32xi32>
    %c31_i32 = arith.constant 31 : i32
    %9 = vector.broadcast %c31_i32 : i32 to vector<32x32xi32>
    %10 = arith.cmpi eq, %1, %9 : vector<32x32xi32>
    %11 = arith.ori %8, %10 : vector<32x32xi1>
    %c1_i32 = arith.constant 1 : i32
    %12 = tpu.dynamic_rotate %0 by %c1_i32 dim 0 : vector<32x32xf32>, i32 -> vector<32x32xf32>
    %cst = arith.constant 0.000000e+00 : f32
    %13 = vector.broadcast %cst : f32 to vector<32x32xf32>
    %14 = arith.select %6, %13, %12 : vector<32x32xi1>, vector<32x32xf32>
    %c31_i32_1 = arith.constant 31 : i32
    %15 = tpu.dynamic_rotate %0 by %c31_i32_1 dim 0 : vector<32x32xf32>, i32 -> vector<32x32xf32>
    %cst_2 = arith.constant 0.000000e+00 : f32
    %16 = vector.broadcast %cst_2 : f32 to vector<32x32xf32>
    %17 = arith.select %11, %16, %15 : vector<32x32xi1>, vector<32x32xf32>
    %18 = tpu.concatenate %14, %0, %17 in 1 : vector<32x32xf32>, vector<32x32xf32>, vector<32x32xf32> -> vector<32x96xf32>
    %19 = arith.truncf %18 : vector<32x96xf32> to vector<32x96xbf16>
    %c0_3 = arith.constant 0 : index
    %c0_4 = arith.constant 0 : index
    %c0_5 = arith.constant 0 : index
    %20 = vector.load %arg1[%c0_3, %c0_4, %c0_5] : memref<4x96x32xbf16, #tpu.memory_space<vmem>>, vector<1x96x32xbf16>
    %21 = vector.shape_cast %20 : vector<1x96x32xbf16> to vector<96x32xbf16>
    %cst_6 = arith.constant dense<0.000000e+00> : vector<32x32xf32>
    %22 = tpu.matmul %19, %21, %cst_6 {dimension_numbers = #tpu.dot_dimension_numbers<[1], [0], [0], [1], [0, 0, 1, 1], [], []>} : vector<32x96xbf16>, vector<96x32xbf16>, vector<32x32xf32> -> vector<32x32xf32>
    %c0_7 = arith.constant 0 : index
    %c0_8 = arith.constant 0 : index
    %c0_9 = arith.constant 0 : index
    %23 = vector.load %arg2[%c0_7, %c0_8, %c0_9] : memref<4x1x32xf32, #tpu.memory_space<vmem>>, vector<1x1x32xf32>
    %24 = vector.shape_cast %23 : vector<1x1x32xf32> to vector<1x32xf32>
    %25 = vector.broadcast %24 : vector<1x32xf32> to vector<32x32xf32>
    %26 = arith.addf %22, %25 : vector<32x32xf32>
    %cst_10 = arith.constant 0.000000e+00 : f32
    %27 = vector.broadcast %cst_10 : f32 to vector<32x32xf32>
    %28 = arith.maximumf %26, %27 : vector<32x32xf32>
    %c1_i32_11 = arith.constant 1 : i32
    %29 = tpu.dynamic_rotate %28 by %c1_i32_11 dim 0 : vector<32x32xf32>, i32 -> vector<32x32xf32>
    %cst_12 = arith.constant 0.000000e+00 : f32
    %30 = vector.broadcast %cst_12 : f32 to vector<32x32xf32>
    %31 = arith.select %6, %30, %29 : vector<32x32xi1>, vector<32x32xf32>
    %c31_i32_13 = arith.constant 31 : i32
    %32 = tpu.dynamic_rotate %28 by %c31_i32_13 dim 0 : vector<32x32xf32>, i32 -> vector<32x32xf32>
    %cst_14 = arith.constant 0.000000e+00 : f32
    %33 = vector.broadcast %cst_14 : f32 to vector<32x32xf32>
    %34 = arith.select %11, %33, %32 : vector<32x32xi1>, vector<32x32xf32>
    %35 = tpu.concatenate %31, %28, %34 in 1 : vector<32x32xf32>, vector<32x32xf32>, vector<32x32xf32> -> vector<32x96xf32>
    %36 = arith.truncf %35 : vector<32x96xf32> to vector<32x96xbf16>
    %c1 = arith.constant 1 : index
    %c0_15 = arith.constant 0 : index
    %c0_16 = arith.constant 0 : index
    %37 = vector.load %arg1[%c1, %c0_15, %c0_16] : memref<4x96x32xbf16, #tpu.memory_space<vmem>>, vector<1x96x32xbf16>
    %38 = vector.shape_cast %37 : vector<1x96x32xbf16> to vector<96x32xbf16>
    %cst_17 = arith.constant dense<0.000000e+00> : vector<32x32xf32>
    %39 = tpu.matmul %36, %38, %cst_17 {dimension_numbers = #tpu.dot_dimension_numbers<[1], [0], [0], [1], [0, 0, 1, 1], [], []>} : vector<32x96xbf16>, vector<96x32xbf16>, vector<32x32xf32> -> vector<32x32xf32>
    %c1_18 = arith.constant 1 : index
    %c0_19 = arith.constant 0 : index
    %c0_20 = arith.constant 0 : index
    %40 = vector.load %arg2[%c1_18, %c0_19, %c0_20] : memref<4x1x32xf32, #tpu.memory_space<vmem>>, vector<1x1x32xf32>
    %41 = vector.shape_cast %40 : vector<1x1x32xf32> to vector<1x32xf32>
    %42 = vector.broadcast %41 : vector<1x32xf32> to vector<32x32xf32>
    %43 = arith.addf %39, %42 : vector<32x32xf32>
    %cst_21 = arith.constant 0.000000e+00 : f32
    %44 = vector.broadcast %cst_21 : f32 to vector<32x32xf32>
    %45 = arith.maximumf %43, %44 : vector<32x32xf32>
    %c1_i32_22 = arith.constant 1 : i32
    %46 = tpu.dynamic_rotate %45 by %c1_i32_22 dim 0 : vector<32x32xf32>, i32 -> vector<32x32xf32>
    %cst_23 = arith.constant 0.000000e+00 : f32
    %47 = vector.broadcast %cst_23 : f32 to vector<32x32xf32>
    %48 = arith.select %6, %47, %46 : vector<32x32xi1>, vector<32x32xf32>
    %c31_i32_24 = arith.constant 31 : i32
    %49 = tpu.dynamic_rotate %45 by %c31_i32_24 dim 0 : vector<32x32xf32>, i32 -> vector<32x32xf32>
    %cst_25 = arith.constant 0.000000e+00 : f32
    %50 = vector.broadcast %cst_25 : f32 to vector<32x32xf32>
    %51 = arith.select %11, %50, %49 : vector<32x32xi1>, vector<32x32xf32>
    %52 = tpu.concatenate %48, %45, %51 in 1 : vector<32x32xf32>, vector<32x32xf32>, vector<32x32xf32> -> vector<32x96xf32>
    %53 = arith.truncf %52 : vector<32x96xf32> to vector<32x96xbf16>
    %c2 = arith.constant 2 : index
    %c0_26 = arith.constant 0 : index
    %c0_27 = arith.constant 0 : index
    %54 = vector.load %arg1[%c2, %c0_26, %c0_27] : memref<4x96x32xbf16, #tpu.memory_space<vmem>>, vector<1x96x32xbf16>
    %55 = vector.shape_cast %54 : vector<1x96x32xbf16> to vector<96x32xbf16>
    %cst_28 = arith.constant dense<0.000000e+00> : vector<32x32xf32>
    %56 = tpu.matmul %53, %55, %cst_28 {dimension_numbers = #tpu.dot_dimension_numbers<[1], [0], [0], [1], [0, 0, 1, 1], [], []>} : vector<32x96xbf16>, vector<96x32xbf16>, vector<32x32xf32> -> vector<32x32xf32>
    %c2_29 = arith.constant 2 : index
    %c0_30 = arith.constant 0 : index
    %c0_31 = arith.constant 0 : index
    %57 = vector.load %arg2[%c2_29, %c0_30, %c0_31] : memref<4x1x32xf32, #tpu.memory_space<vmem>>, vector<1x1x32xf32>
    %58 = vector.shape_cast %57 : vector<1x1x32xf32> to vector<1x32xf32>
    %59 = vector.broadcast %58 : vector<1x32xf32> to vector<32x32xf32>
    %60 = arith.addf %56, %59 : vector<32x32xf32>
    %cst_32 = arith.constant 0.000000e+00 : f32
    %61 = vector.broadcast %cst_32 : f32 to vector<32x32xf32>
    %62 = arith.maximumf %60, %61 : vector<32x32xf32>
    %c1_i32_33 = arith.constant 1 : i32
    %63 = tpu.dynamic_rotate %62 by %c1_i32_33 dim 0 : vector<32x32xf32>, i32 -> vector<32x32xf32>
    %cst_34 = arith.constant 0.000000e+00 : f32
    %64 = vector.broadcast %cst_34 : f32 to vector<32x32xf32>
    %65 = arith.select %6, %64, %63 : vector<32x32xi1>, vector<32x32xf32>
    %c31_i32_35 = arith.constant 31 : i32
    %66 = tpu.dynamic_rotate %62 by %c31_i32_35 dim 0 : vector<32x32xf32>, i32 -> vector<32x32xf32>
    %cst_36 = arith.constant 0.000000e+00 : f32
    %67 = vector.broadcast %cst_36 : f32 to vector<32x32xf32>
    %68 = arith.select %11, %67, %66 : vector<32x32xi1>, vector<32x32xf32>
    %69 = tpu.concatenate %65, %62, %68 in 1 : vector<32x32xf32>, vector<32x32xf32>, vector<32x32xf32> -> vector<32x96xf32>
    %70 = arith.truncf %69 : vector<32x96xf32> to vector<32x96xbf16>
    %c3 = arith.constant 3 : index
    %c0_37 = arith.constant 0 : index
    %c0_38 = arith.constant 0 : index
    %71 = vector.load %arg1[%c3, %c0_37, %c0_38] : memref<4x96x32xbf16, #tpu.memory_space<vmem>>, vector<1x96x32xbf16>
    %72 = vector.shape_cast %71 : vector<1x96x32xbf16> to vector<96x32xbf16>
    %cst_39 = arith.constant dense<0.000000e+00> : vector<32x32xf32>
    %73 = tpu.matmul %70, %72, %cst_39 {dimension_numbers = #tpu.dot_dimension_numbers<[1], [0], [0], [1], [0, 0, 1, 1], [], []>} : vector<32x96xbf16>, vector<96x32xbf16>, vector<32x32xf32> -> vector<32x32xf32>
    %c3_40 = arith.constant 3 : index
    %c0_41 = arith.constant 0 : index
    %c0_42 = arith.constant 0 : index
    %74 = vector.load %arg2[%c3_40, %c0_41, %c0_42] : memref<4x1x32xf32, #tpu.memory_space<vmem>>, vector<1x1x32xf32>
    %75 = vector.shape_cast %74 : vector<1x1x32xf32> to vector<1x32xf32>
    %76 = vector.broadcast %75 : vector<1x32xf32> to vector<32x32xf32>
    %77 = arith.addf %73, %76 : vector<32x32xf32>
    %cst_43 = arith.constant 0.000000e+00 : f32
    %78 = vector.broadcast %cst_43 : f32 to vector<32x32xf32>
    %79 = arith.maximumf %77, %78 : vector<32x32xf32>
    %c0_44 = arith.constant 0 : index
    %c0_45 = arith.constant 0 : index
    %80 = vector.load %arg3[%c0_44, %c0_45] : memref<32x32xf32, #tpu.memory_space<vmem>>, vector<32x32xf32>
    tpu.vector_store %arg3[%c0_44, %c0_45], %79 {strides = array<i32>} : memref<32x32xf32, #tpu.memory_space<vmem>>, vector<32x32xf32>,
    return
  }
}

</mosaic_0001>

<bundles_post_ra>
// kernel: block_forward_nlc.1
= control target key start
LH: loop header
LB: loop body
LE: loop exit
PB: predicated region body
PF: predicated region fallthrough
CT: control target
= control target key end

     0   :  { %v20_v3 = vlaneseq  ;;  %s1102_s20 = smov 32   ;;  %s1103_s26 = smov 64   ;;  %s1399_s0 = inlined_call_operand.vmem [shape: f32[32,32], index: 0, kind: input, shape index: {}]   ;;  %s1400_s1 = inlined_call_operand.vmem [shape: bf16[4,96,32], index: 1, kind: input, shape index: {}]   ;;  %s1401_s2 = inlined_call_operand.vmem [shape: f32[4,1,32], index: 2, kind: input, shape index: {}]   ;;  %s1402_s3 = inlined_call_operand.hbm [shape: f32[32,32], index: 3, kind: output, shape index: {}]  }
   0x1   :  { %v16_v0 = vld [vmem:[%s1399_s0] sm:$0xff]  ;;  %v17_v1 = vld [vmem:[%s1399_s0 + $0x8] sm:$0xff]  ;;  %v18_v2 = vld [vmem:[%s1399_s0 + $0x10] sm:$0xff] }
   0x2   :  { %v50_v4 = vrot.slane %v17_v1, 7  ;;  %v63_v5 = vrot.slane %v17_v1, 1  ;;  %v976_v6 = vpack.i.bf16 %v17_v1, %v16_v0  ;;  %v49_v7 = vrot.slane %v16_v0, 7  ;;  %v19_v8 = vld [vmem:[%s1399_s0 + $0x18] sm:$0xff]  ;;  %v1056_v16 = vld [vmem:[%s1400_s1 + $0x28] sm:$0xff]   ;;  %v1057_v17 = vld [vmem:[%s1400_s1 + $0x20] sm:$0xff]  }
   0x3   :  { %v62_v9 = vrot.slane %v16_v0, 1  ;;  %v1139_v10 = vshrl.u32 %v20_v3, 7  ;;  %v51_v11 = vrot.slane %v18_v2, 7  ;;  %v64_v12 = vrot.slane %v18_v2, 1  ;;  %907 = vmatprep.subr.bf16.mxu0 %v1056_v16  ;;  %v1058_v28 = vld [vmem:[%s1400_s1 + $0x18] sm:$0xff]   ;;  %v1059_v33 = vld [vmem:[%s1400_s1 + $0x10] sm:$0xff]  }
   0x4   :  { %977 = vrot.lane.b32.xlu0 %v976_v6, %s1102_s20  ;;  %v52_v13 = vrot.slane %v19_v8, 7  ;;  %v65_v14 = vrot.slane %v19_v8, 1  ;;  %v981_v15 = vpack.i.bf16 %v19_v8, %v18_v2  ;;  %908 = vmatpush3.bf16.msra.mxu0 %v1056_v16  ;;  %v1060_v34 = vld [vmem:[%s1400_s1 + $0x8] sm:$0xff]   ;;  %v1061_v35 = vld [vmem:[%s1400_s1] sm:$0xff]  }
   0x5   :  { %v1149_v18 = vadd.s32 8, %v1139_v10  ;;  %vm53_vm0 = vcmp.lt.s32.totalorder %v1139_v10, 1  ;;  %vm66_vm1 = vcmp.lt.s32.totalorder %v1139_v10, 7  ;;  %v1154_v19 = vadd.s32 24, %v1139_v10  ;;  %909 = vmatprep.subr.bf16.mxu0 %v1057_v17 }
   0x6   :  { %v68_v20 = vsel %vm66_vm1, %v63_v5, %v64_v12  ;;  %v69_v21 = vsel %vm66_vm1, %v62_v9, %v63_v5  ;;  %v67_v22 = vsel %vm66_vm1, %v64_v12, %v65_v14  ;;  %v70_v23 = vsel %vm66_vm1, %v65_v14, %v62_v9 }
   0x7   :  { %vm38_vm2 = vcmp.eq.s32.totalorder %v1149_v18, 15  ;;  %vm44_vm3 = vcmp.eq.s32.totalorder %v1154_v19, 31  ;;  %v54_v24 = vsel %vm53_vm0, %v51_v11, %v52_v13  ;;  %v55_v25 = vsel %vm53_vm0, %v50_v4, %v51_v11 }
   0x8   :  { %v72_v26 = vsel %vm38_vm2, 0.0, %v68_v20  ;;  %982 = vrot.lane.b32.xlu0 %v981_v15, %s1102_s20  ;;  %v74_v27 = vsel %vm44_vm3, 0.0, %v70_v23  ;;  %v56_v29 = vsel %vm53_vm0, %v49_v7, %v50_v4  ;;  %v57_v30 = vsel %vm53_vm0, %v52_v13, %v49_v7  ;;  %910 = vmatpush3.bf16.msra.mxu0 %v1057_v17 }
   0x9   :  { %v986_v31 = vpack.i.bf16 %v72_v26, %v69_v21  ;;  %v991_v32 = vpack.i.bf16 %v74_v27, %v67_v22  ;;  %911 = vmatprep.subr.bf16.mxu0 %v1058_v28 }
   0xb   :  { %987 = vrot.lane.b32.xlu1 %v986_v31, %s1103_s26 }
   0xc   :  { %912 = vmatpush3.bf16.msra.mxu0 %v1058_v28 }
   0xd   :  { %913 = vmatprep.subr.bf16.mxu0 %v1059_v33 }
   0xf   :  { %992 = vrot.lane.b32.xlu1 %v991_v32, %s1103_s26 }
  0x10   :  { %914 = vmatpush3.bf16.msra.mxu0 %v1059_v33 }
  0x11   :  { %915 = vmatprep.subr.bf16.mxu0 %v1060_v34 }
  0x14   :  { %916 = vmatpush3.bf16.msra.mxu0 %v1060_v34 }
  0x15   :  { %8 = vsyncpa [#allocation3], 0  ;;  %917 = vmatprep.subr.bf16.mxu0 %v1061_v35  ;;  %v1194_v37 = vadd.s32 16, %v1139_v10  ;;  %vm25_vm4 = vcmp.eq.s32.totalorder %v1139_v10, 0  ;;  %vm107_vm5 = vcmask 261120   ;;  %vm112_vm7 = vcmask 523264  }
  0x16   :  { %v58_v41 = vsel %vm25_vm4, 0.0, %v57_v30  ;;  %vm174_vm8 = vcmask 785408   ;;  %v1062_v61 = vld [vmem:[%s1400_s1 + $0x58] sm:$0xff]   ;;  %v1063_v62 = vld [vmem:[%s1400_s1 + $0x50] sm:$0xff]   ;;  %v1064_v63 = vld [vmem:[%s1400_s1 + $0x48] sm:$0xff]  }
  0x17   :  { %vm31_vm6 = vcmp.eq.s32.totalorder %v1194_v37, 16  ;;  %923 = vmatprep.subr.bf16.mxu1 %v1062_v61  ;;  %v1065_v0 = vld [vmem:[%s1400_s1 + $0x40] sm:$0xff]   ;;  %v1066_v4 = vld [vmem:[%s1400_s1 + $0x38] sm:$0xff]   ;;  %v1067_v11 = vld [vmem:[%s1400_s1 + $0x30] sm:$0xff]  }
  0x18   :  { %918 = vmatpush3.bf16.msra.mxu0 %v1061_v35  ;;  %v60_v49 = vsel %vm31_vm6, 0.0, %v55_v25  ;;  %924 = vmatpush3.bf16.msra.mxu1 %v1062_v61  ;;  %v800_v1 = vld [vmem:[%s1401_s2] ss:$0 sm:$0xff] }
  0x19   :  { %925 = vmatprep.subr.bf16.mxu1 %v1063_v62 }
  0x1c   :  { %926 = vmatpush3.bf16.msra.mxu1 %v1063_v62 }
  0x1d   :  { %927 = vmatprep.subr.bf16.mxu1 %v1064_v63 }
  0x20   :  { %928 = vmatpush3.bf16.msra.mxu1 %v1064_v63 }
  0x21   :  { %929 = vmatprep.subr.bf16.mxu1 %v1065_v0 }
  0x24   :  { %930 = vmatpush3.bf16.msra.mxu1 %v1065_v0 }
  0x25   :  { %931 = vmatprep.subr.bf16.mxu1 %v1066_v4 }
  0x28   :  { %932 = vmatpush3.bf16.msra.mxu1 %v1066_v4  ;;  %v1070_v4 = vld [vmem:[%s1400_s1 + $0x78] sm:$0xff]  }
  0x29   :  { %933 = vmatprep.subr.bf16.mxu1 %v1067_v11 }
  0x2c   :  { %934 = vmatpush3.bf16.msra.mxu1 %v1067_v11 }
  0x76   :  { %v978_v36 = vpop.permute.xlu0 %977 }
  0x77   :  { %v980_v38 = vunpack.i.h.bf16 %v978_v36  ;;  %v979_v39 = vunpack.i.l.bf16 %v978_v36 }
  0x79   :  { %v108_v45 = vsel %vm107_vm5, %v58_v41, %v979_v39  ;;  %v109_v46 = vsel %vm107_vm5, %v56_v29, %v980_v38 }
  0x7a   :  { %v983_v40 = vpop.permute.xlu0 %982 }
  0x7b   :  { %v985_v43 = vunpack.i.h.bf16 %v983_v40  ;;  %v984_v44 = vunpack.i.l.bf16 %v983_v40 }
  0x7d   :  { %v988_v42 = vpop.permute.xlu1 %987  ;;  %v111_v52 = vsel %vm107_vm5, %v54_v24, %v985_v43  ;;  %v110_v53 = vsel %vm107_vm5, %v60_v49, %v984_v44 }
  0x7e   :  { %v990_v47 = vunpack.i.h.bf16 %v988_v42  ;;  %v989_v48 = vunpack.i.l.bf16 %v988_v42 }
  0x80   :  { %v113_v50 = vsel %vm112_vm7, %v108_v45, %v989_v48  ;;  %v114_v51 = vsel %vm112_vm7, %v109_v46, %v990_v47 }
  0x81   :  { %v993_v54 = vpop.permute.xlu1 %992  ;;  %v117_v55 = vpack.c.bf16 %v114_v51, %v113_v50 }
  0x82   :  { %v995_v56 = vunpack.i.h.bf16 %v993_v54  ;;  %v994_v57 = vunpack.i.l.bf16 %v993_v54 }
  0x83   :  { %919 = vmatprep.mubr.msk.bf16.mxu0 %vm174_vm8, %v117_v55 }
  0x84   :  { %v116_v58 = vsel %vm112_vm7, %v111_v52, %v995_v56  ;;  %v115_v59 = vsel %vm112_vm7, %v110_v53, %v994_v57 }
  0x85   :  { %v118_v60 = vpack.c.bf16 %v116_v58, %v115_v59 }
  0x87   :  { %920 = vmatmul.mubr.msk.bf16.vlgmr.msra.gmra.mxu0 %vm174_vm8, %v118_v60 }
 0x147   :  { %v921_v2 = vpop.f32.mrf.mxu0 }
 0x148   :  { %v224_v3 = vadd.f32 %v921_v2, %v800_v1  ;;  %v1068_v2 = vld [vmem:[%s1400_s1 + $0x88] sm:$0xff]  }
 0x149   :  { %v215_v5 = vpop.f32.mrf.mxu0  ;;  %939 = vmatprep.subr.bf16.mxu0 %v1068_v2 }
 0x14a   :  { %v216_v6 = vadd.f32 %v800_v1, %v215_v5  ;;  %v232_v7 = vmax.f32 %v224_v3, 0.0  ;;  %v1069_v3 = vld [vmem:[%s1400_s1 + $0x80] sm:$0xff]   ;;  %940 = vmatpush3.bf16.msra.mxu0 %v1068_v2 }
 0x14b   :  { %v922_v8 = vpop.f32.mrf.mxu0  ;;  %941 = vmatprep.subr.bf16.mxu0 %v1069_v3  ;;  %v822_v5 = vld [vmem:[%s1401_s2 + $0x1] ss:$0 sm:$0xff] }
 0x14c   :  { %v227_v9 = vadd.f32 %v922_v8, %v800_v1  ;;  %v230_v12 = vmax.f32 %v216_v6, 0.0  ;;  %v248_v16 = vrot.slane %v232_v7, 1  ;;  %v236_v23 = vrot.slane %v232_v7, 7  ;;  %v1071_v6 = vld [vmem:[%s1400_s1 + $0x70] sm:$0xff]  }
 0x14d   :  { %v218_v13 = vpop.f32.mrf.mxu0 }
 0x14e   :  { %v233_v14 = vmax.f32 %v227_v9, 0.0  ;;  %v219_v15 = vadd.f32 %v800_v1, %v218_v13  ;;  %v234_v24 = vrot.slane %v230_v12, 7  ;;  %v246_v25 = vrot.slane %v230_v12, 1  ;;  %942 = vmatpush3.bf16.msra.mxu0 %v1069_v3 }
 0x14f   :  { %943 = vmatprep.subr.bf16.mxu0 %v1070_v4 }
 0x150   :  { %v237_v17 = vrot.slane %v233_v14, 7  ;;  %v249_v20 = vrot.slane %v233_v14, 1  ;;  %v231_v21 = vmax.f32 %v219_v15, 0.0  ;;  %v996_v22 = vpack.i.bf16 %v233_v14, %v232_v7 }
 0x152   :  { %v235_v26 = vrot.slane %v231_v21, 7  ;;  %v247_v27 = vrot.slane %v231_v21, 1  ;;  %997 = vrot.lane.b32.xlu1 %v996_v22, %s1102_s20  ;;  %v1001_v28 = vpack.i.bf16 %v231_v21, %v230_v12  ;;  %v250_v29 = vsel %vm66_vm1, %v248_v16, %v249_v20  ;;  %944 = vmatpush3.bf16.msra.mxu0 %v1070_v4  ;;  %v1072_v12 = vld [vmem:[%s1400_s1 + $0x68] sm:$0xff]   ;;  %v1073_v22 = vld [vmem:[%s1400_s1 + $0x60] sm:$0xff]  }
 0x153   :  { %v253_v30 = vsel %vm66_vm1, %v249_v20, %v246_v25  ;;  %v238_v31 = vsel %vm53_vm0, %v236_v23, %v237_v17  ;;  %v241_v32 = vsel %vm53_vm0, %v237_v17, %v234_v24  ;;  %945 = vmatprep.subr.bf16.mxu0 %v1071_v6 }
 0x154   :  { %1002 = vrot.lane.b32.xlu0 %v1001_v28, %s1102_s20  ;;  %v257_v33 = vsel %vm44_vm3, 0.0, %v253_v30  ;;  %v251_v34 = vsel %vm66_vm1, %v247_v27, %v248_v16  ;;  %v252_v35 = vsel %vm66_vm1, %v246_v25, %v247_v27  ;;  %v239_v36 = vsel %vm53_vm0, %v235_v26, %v236_v23 }
 0x155   :  { %v1011_v38 = vpack.i.bf16 %v257_v33, %v250_v29  ;;  %v255_v39 = vsel %vm38_vm2, 0.0, %v251_v34  ;;  %v240_v40 = vsel %vm53_vm0, %v234_v24, %v235_v26  ;;  %v244_v49 = vsel %vm31_vm6, 0.0, %v239_v36 }
 0x156   :  { %v1006_v41 = vpack.i.bf16 %v255_v39, %v252_v35  ;;  %v242_v53 = vsel %vm25_vm4, 0.0, %v241_v32  ;;  %946 = vmatpush3.bf16.msra.mxu0 %v1071_v6 }
 0x157   :  { %1012 = vrot.lane.b32.xlu1 %v1011_v38, %s1103_s26  ;;  %947 = vmatprep.subr.bf16.mxu0 %v1072_v12 }
 0x158   :  { %1007 = vrot.lane.b32.xlu0 %v1006_v41, %s1103_s26 }
 0x15a   :  { %948 = vmatpush3.bf16.msra.mxu0 %v1072_v12  ;;  %v1077_v12 = vld [vmem:[%s1400_s1 + $0xa0] sm:$0xff]  }
 0x15b   :  { %949 = vmatprep.subr.bf16.mxu0 %v1073_v22 }
 0x15e   :  { %950 = vmatpush3.bf16.msra.mxu0 %v1073_v22 }
 0x1c4   :  { %v998_v42 = vpop.permute.xlu1 %997 }
 0x1c5   :  { %v1000_v44 = vunpack.i.h.bf16 %v998_v42  ;;  %v999_v45 = vunpack.i.l.bf16 %v998_v42 }
 0x1c6   :  { %v1003_v43 = vpop.permute.xlu0 %1002 }
 0x1c7   :  { %v1005_v46 = vunpack.i.h.bf16 %v1003_v43  ;;  %v1004_v47 = vunpack.i.l.bf16 %v1003_v43  ;;  %v292_v54 = vsel %vm107_vm5, %v244_v49, %v999_v45  ;;  %v293_v55 = vsel %vm107_vm5, %v238_v31, %v1000_v44 }
 0x1c9   :  { %v1013_v48 = vpop.permute.xlu1 %1012  ;;  %v290_v60 = vsel %vm107_vm5, %v242_v53, %v1004_v47  ;;  %v291_v61 = vsel %vm107_vm5, %v240_v40, %v1005_v46 }
 0x1ca   :  { %v1015_v50 = vunpack.i.h.bf16 %v1013_v48  ;;  %v1014_v51 = vunpack.i.l.bf16 %v1013_v48  ;;  %v1008_v52 = vpop.permute.xlu0 %1007 }
 0x1cb   :  { %v1010_v56 = vunpack.i.h.bf16 %v1008_v52  ;;  %v1009_v57 = vunpack.i.l.bf16 %v1008_v52 }
 0x1cc   :  { %v297_v58 = vsel %vm112_vm7, %v293_v55, %v1015_v50  ;;  %v296_v59 = vsel %vm112_vm7, %v292_v54, %v1014_v51 }
 0x1cd   :  { %v299_v62 = vpack.c.bf16 %v297_v58, %v296_v59  ;;  %v294_v63 = vsel %vm112_vm7, %v290_v60, %v1009_v57  ;;  %v295_v0 = vsel %vm112_vm7, %v291_v61, %v1010_v56 }
 0x1ce   :  { %v298_v1 = vpack.c.bf16 %v295_v0, %v294_v63 }
 0x1d0   :  { %935 = vmatprep.mubr.msk.bf16.mxu1 %vm174_vm8, %v298_v1 }
 0x1d1   :  { %936 = vmatmul.mubr.msk.bf16.vlgmr.msra.gmra.mxu1 %vm174_vm8, %v299_v62 }
 0x291   :  { %v937_v7 = vpop.f32.mrf.mxu1 }
 0x292   :  { %v406_v8 = vadd.f32 %v937_v7, %v822_v5  ;;  %v1074_v7 = vld [vmem:[%s1400_s1 + $0xb8] sm:$0xff]  }
 0x293   :  { %v397_v9 = vpop.f32.mrf.mxu1  ;;  %955 = vmatprep.subr.bf16.mxu1 %v1074_v7 }
 0x294   :  { %v398_v11 = vadd.f32 %v822_v5, %v397_v9  ;;  %v414_v13 = vmax.f32 %v406_v8, 0.0  ;;  %v1075_v8 = vld [vmem:[%s1400_s1 + $0xb0] sm:$0xff]   ;;  %956 = vmatpush3.bf16.msra.mxu1 %v1074_v7  ;;  %v1076_v9 = vld [vmem:[%s1400_s1 + $0xa8] sm:$0xff]  }
 0x295   :  { %v938_v14 = vpop.f32.mrf.mxu1  ;;  %957 = vmatprep.subr.bf16.mxu1 %v1075_v8 }
 0x296   :  { %v409_v15 = vadd.f32 %v938_v14, %v822_v5  ;;  %v412_v16 = vmax.f32 %v398_v11, 0.0  ;;  %v430_v23 = vrot.slane %v414_v13, 1  ;;  %v418_v28 = vrot.slane %v414_v13, 7  ;;  %v844_v11 = vld [vmem:[%s1401_s2 + $0x2] ss:$0 sm:$0xff] }
 0x297   :  { %v400_v17 = vpop.f32.mrf.mxu1 }
 0x298   :  { %v415_v20 = vmax.f32 %v409_v15, 0.0  ;;  %v401_v21 = vadd.f32 %v822_v5, %v400_v17  ;;  %v416_v29 = vrot.slane %v412_v16, 7  ;;  %v428_v30 = vrot.slane %v412_v16, 1  ;;  %958 = vmatpush3.bf16.msra.mxu1 %v1075_v8  ;;  %v1078_v17 = vld [vmem:[%s1400_s1 + $0x98] sm:$0xff]   ;;  %v866_v8 = vld [vmem:[%s1401_s2 + $0x3] ss:$0 sm:$0xff] }
 0x299   :  { %959 = vmatprep.subr.bf16.mxu1 %v1076_v9 }
 0x29a   :  { %v419_v24 = vrot.slane %v415_v20, 7  ;;  %v431_v25 = vrot.slane %v415_v20, 1  ;;  %v413_v26 = vmax.f32 %v401_v21, 0.0  ;;  %v1016_v27 = vpack.i.bf16 %v415_v20, %v414_v13 }
 0x29c   :  { %v417_v31 = vrot.slane %v413_v26, 7  ;;  %v429_v32 = vrot.slane %v413_v26, 1  ;;  %1017 = vrot.lane.b32.xlu1 %v1016_v27, %s1102_s20  ;;  %v1021_v33 = vpack.i.bf16 %v413_v26, %v412_v16  ;;  %v432_v34 = vsel %vm66_vm1, %v430_v23, %v431_v25  ;;  %960 = vmatpush3.bf16.msra.mxu1 %v1076_v9  ;;  %v1079_v27 = vld [vmem:[%s1400_s1 + $0x90] sm:$0xff]  }
 0x29d   :  { %v435_v35 = vsel %vm66_vm1, %v431_v25, %v428_v30  ;;  %v420_v36 = vsel %vm53_vm0, %v418_v28, %v419_v24  ;;  %v423_v38 = vsel %vm53_vm0, %v419_v24, %v416_v29  ;;  %961 = vmatprep.subr.bf16.mxu1 %v1077_v12 }
 0x29e   :  { %1022 = vrot.lane.b32.xlu0 %v1021_v33, %s1102_s20  ;;  %v439_v39 = vsel %vm44_vm3, 0.0, %v435_v35  ;;  %v433_v40 = vsel %vm66_vm1, %v429_v32, %v430_v23  ;;  %v434_v41 = vsel %vm66_vm1, %v428_v30, %v429_v32  ;;  %v421_v42 = vsel %vm53_vm0, %v417_v31, %v418_v28 }
 0x29f   :  { %v1031_v43 = vpack.i.bf16 %v439_v39, %v432_v34  ;;  %v437_v44 = vsel %vm38_vm2, 0.0, %v433_v40  ;;  %v422_v45 = vsel %vm53_vm0, %v416_v29, %v417_v31  ;;  %v426_v54 = vsel %vm31_vm6, 0.0, %v421_v42 }
 0x2a0   :  { %v1026_v46 = vpack.i.bf16 %v437_v44, %v434_v41  ;;  %v424_v55 = vsel %vm25_vm4, 0.0, %v423_v38  ;;  %962 = vmatpush3.bf16.msra.mxu1 %v1077_v12 }
 0x2a1   :  { %1032 = vrot.lane.b32.xlu1 %v1031_v43, %s1103_s26  ;;  %963 = vmatprep.subr.bf16.mxu1 %v1078_v17 }
 0x2a2   :  { %1027 = vrot.lane.b32.xlu0 %v1026_v46, %s1103_s26 }
 0x2a4   :  { %964 = vmatpush3.bf16.msra.mxu1 %v1078_v17 }
 0x2a5   :  { %965 = vmatprep.subr.bf16.mxu1 %v1079_v27 }
 0x2a8   :  { %966 = vmatpush3.bf16.msra.mxu1 %v1079_v27 }
 0x30e   :  { %v1018_v47 = vpop.permute.xlu1 %1017 }
 0x30f   :  { %v1020_v49 = vunpack.i.h.bf16 %v1018_v47  ;;  %v1019_v50 = vunpack.i.l.bf16 %v1018_v47 }
 0x310   :  { %v1023_v48 = vpop.permute.xlu0 %1022 }
 0x311   :  { %v1025_v51 = vunpack.i.h.bf16 %v1023_v48  ;;  %v1024_v52 = vunpack.i.l.bf16 %v1023_v48  ;;  %v474_v59 = vsel %vm107_vm5, %v426_v54, %v1019_v50  ;;  %v475_v60 = vsel %vm107_vm5, %v420_v36, %v1020_v49 }
 0x313   :  { %v1033_v53 = vpop.permute.xlu1 %1032  ;;  %v472_v63 = vsel %vm107_vm5, %v424_v55, %v1024_v52  ;;  %v473_v0 = vsel %vm107_vm5, %v422_v45, %v1025_v51 }
 0x314   :  { %v1035_v56 = vunpack.i.h.bf16 %v1033_v53  ;;  %v1034_v57 = vunpack.i.l.bf16 %v1033_v53  ;;  %v1028_v58 = vpop.permute.xlu0 %1027 }
 0x315   :  { %v1030_v61 = vunpack.i.h.bf16 %v1028_v58  ;;  %v1029_v62 = vunpack.i.l.bf16 %v1028_v58 }
 0x316   :  { %v479_v1 = vsel %vm112_vm7, %v475_v60, %v1035_v56  ;;  %v478_v2 = vsel %vm112_vm7, %v474_v59, %v1034_v57 }
 0x317   :  { %v481_v3 = vpack.c.bf16 %v479_v1, %v478_v2  ;;  %v476_v4 = vsel %vm112_vm7, %v472_v63, %v1029_v62  ;;  %v477_v5 = vsel %vm112_vm7, %v473_v0, %v1030_v61 }
 0x318   :  { %v480_v6 = vpack.c.bf16 %v477_v5, %v476_v4 }
 0x31a   :  { %951 = vmatprep.mubr.msk.bf16.mxu0 %vm174_vm8, %v480_v6 }
 0x31b   :  { %952 = vmatmul.mubr.msk.bf16.vlgmr.msra.gmra.mxu0 %vm174_vm8, %v481_v3 }
 0x3db   :  { %v953_v13 = vpop.f32.mrf.mxu0 }
 0x3dc   :  { %v588_v14 = vadd.f32 %v953_v13, %v844_v11 }
 0x3dd   :  { %v579_v15 = vpop.f32.mrf.mxu0 }
 0x3de   :  { %v580_v16 = vadd.f32 %v844_v11, %v579_v15  ;;  %v596_v20 = vmax.f32 %v588_v14, 0.0 }
 0x3df   :  { %v954_v21 = vpop.f32.mrf.mxu0 }
 0x3e0   :  { %v591_v22 = vadd.f32 %v954_v21, %v844_v11  ;;  %v594_v23 = vmax.f32 %v580_v16, 0.0  ;;  %v612_v28 = vrot.slane %v596_v20, 1  ;;  %v600_v33 = vrot.slane %v596_v20, 7 }
 0x3e1   :  { %v582_v24 = vpop.f32.mrf.mxu0 }
 0x3e2   :  { %v597_v25 = vmax.f32 %v591_v22, 0.0  ;;  %v583_v26 = vadd.f32 %v844_v11, %v582_v24  ;;  %v598_v34 = vrot.slane %v594_v23, 7  ;;  %v610_v35 = vrot.slane %v594_v23, 1 }
 0x3e4   :  { %v601_v29 = vrot.slane %v597_v25, 7  ;;  %v613_v30 = vrot.slane %v597_v25, 1  ;;  %v595_v31 = vmax.f32 %v583_v26, 0.0  ;;  %v1036_v32 = vpack.i.bf16 %v597_v25, %v596_v20 }
 0x3e6   :  { %v599_v36 = vrot.slane %v595_v31, 7  ;;  %v611_v38 = vrot.slane %v595_v31, 1  ;;  %1037 = vrot.lane.b32.xlu1 %v1036_v32, %s1102_s20  ;;  %v1041_v39 = vpack.i.bf16 %v595_v31, %v594_v23  ;;  %v614_v40 = vsel %vm66_vm1, %v612_v28, %v613_v30 }
 0x3e7   :  { %v617_v41 = vsel %vm66_vm1, %v613_v30, %v610_v35  ;;  %v602_v42 = vsel %vm53_vm0, %v600_v33, %v601_v29  ;;  %v605_v43 = vsel %vm53_vm0, %v601_v29, %v598_v34 }
 0x3e8   :  { %1042 = vrot.lane.b32.xlu0 %v1041_v39, %s1102_s20  ;;  %v621_v44 = vsel %vm44_vm3, 0.0, %v617_v41  ;;  %v615_v45 = vsel %vm66_vm1, %v611_v38, %v612_v28  ;;  %v616_v46 = vsel %vm66_vm1, %v610_v35, %v611_v38  ;;  %v603_v47 = vsel %vm53_vm0, %v599_v36, %v600_v33 }
 0x3e9   :  { %v1051_v48 = vpack.i.bf16 %v621_v44, %v614_v40  ;;  %v619_v49 = vsel %vm38_vm2, 0.0, %v615_v45  ;;  %v604_v50 = vsel %vm53_vm0, %v598_v34, %v599_v36  ;;  %v608_v58 = vsel %vm31_vm6, 0.0, %v603_v47 }
 0x3ea   :  { %v1046_v51 = vpack.i.bf16 %v619_v49, %v616_v46  ;;  %v606_v18 = vsel %vm25_vm4, 0.0, %v605_v43 }
 0x3eb   :  { %1052 = vrot.lane.b32.xlu1 %v1051_v48, %s1103_s26 }
 0x3ec   :  { %1047 = vrot.lane.b32.xlu0 %v1046_v51, %s1103_s26  ;;  %s1104_s26 = smov [#allocation2]  }
 0x3ed   :  { %s789_s23 = sshll.u32 %s1104_s26, 4  ;;  %s790_s23 = int_to_ptr.vmem [resolvable:$true] %s789_s23 }
 0x3ee   :  { %s1080_s2 = scalar_lea.vmem %s790_s23, 512  ;;  %p1085_p1 = scmp.lt.s32.totalorder %s790_s23, %s790_s23 }
 0x3ef   :  { %p1081_p0 = scmp.ne.s32.totalorder %s790_s23, %s1080_s2  ;;  %p1086_p2 = scmp.lt.s32.totalorder %s1080_s2, %s1080_s2 }
 0x3f1   :  { %p1087_p3 = por %p1086_p2, %p1085_p1 }
 0x3f3   :  { %p1088_p4 = pnand %p1087_p3, %p1081_p0 }
 0x458   :  { %v1038_v19 = vpop.permute.xlu1 %1037 }
 0x459   :  { %v1040_v53 = vunpack.i.h.bf16 %v1038_v19  ;;  %v1039_v54 = vunpack.i.l.bf16 %v1038_v19 }
 0x45a   :  { %v1043_v52 = vpop.permute.xlu0 %1042 }
 0x45b   :  { %v1045_v55 = vunpack.i.h.bf16 %v1043_v52  ;;  %v1044_v56 = vunpack.i.l.bf16 %v1043_v52  ;;  %v656_v62 = vsel %vm107_vm5, %v608_v58, %v1039_v54  ;;  %v657_v63 = vsel %vm107_vm5, %v602_v42, %v1040_v53 }
 0x45d   :  { %v1053_v57 = vpop.permute.xlu1 %1052  ;;  %v654_v2 = vsel %vm107_vm5, %v606_v18, %v1044_v56  ;;  %v655_v3 = vsel %vm107_vm5, %v604_v50, %v1045_v55 }
 0x45e   :  { %v1055_v59 = vunpack.i.h.bf16 %v1053_v57  ;;  %v1054_v60 = vunpack.i.l.bf16 %v1053_v57  ;;  %v1048_v61 = vpop.permute.xlu0 %1047 }
 0x45f   :  { %v1050_v0 = vunpack.i.h.bf16 %v1048_v61  ;;  %v1049_v1 = vunpack.i.l.bf16 %v1048_v61 }
 0x460   :  { %v661_v4 = vsel %vm112_vm7, %v657_v63, %v1055_v59  ;;  %v660_v37 = vsel %vm112_vm7, %v656_v62, %v1054_v60 }
 0x461   :  { %v663_v5 = vpack.c.bf16 %v661_v4, %v660_v37  ;;  %v658_v10 = vsel %vm112_vm7, %v654_v2, %v1049_v1  ;;  %v659_v6 = vsel %vm112_vm7, %v655_v3, %v1050_v0 }
 0x462   :  { %v662_v7 = vpack.c.bf16 %v659_v6, %v658_v10 }
 0x464   :  { %967 = vmatprep.mubr.msk.bf16.mxu1 %vm174_vm8, %v662_v7 }
 0x465   :  { %968 = vmatmul.mubr.msk.bf16.vlgmr.msra.gmra.mxu1 %vm174_vm8, %v663_v5 }
 0x525   :  { %v969_v9 = vpop.f32.mrf.mxu1 }
 0x526   :  { %v770_v11 = vadd.f32 %v969_v9, %v866_v8 }
 0x527   :  { %v761_v12 = vpop.f32.mrf.mxu1 }
 0x528   :  { %v778_v13 = vmax.f32 %v770_v11, 0.0  ;;  %v762_v14 = vadd.f32 %v866_v8, %v761_v12 }
 0x529   :  { %v970_v15 = vpop.f32.mrf.mxu1 }
 0x52a   :  { %782 = vst.msk [vmem:[#allocation2 + $0x10] sm:$0xff] %vm107_vm5, %v778_v13  ;;  %v776_v16 = vmax.f32 %v762_v14, 0.0  ;;  %v773_v17 = vadd.f32 %v970_v15, %v866_v8 }
 0x52b   :  { %v764_v20 = vpop.f32.mrf.mxu1 }
 0x52c   :  { %780 = vst.msk [vmem:[#allocation2] sm:$0xff] %vm107_vm5, %v776_v16  ;;  %v779_v21 = vmax.f32 %v773_v17, 0.0  ;;  %v765_v22 = vadd.f32 %v866_v8, %v764_v20 }
 0x52e   :  { %783 = vst.msk [vmem:[#allocation2 + $0x18] sm:$0xff] %vm107_vm5, %v779_v21  ;;  %v777_v23 = vmax.f32 %v765_v22, 0.0 }
 0x530   :  { %781 = vst.msk [vmem:[#allocation2 + $0x8] sm:$0xff] %vm107_vm5, %v777_v23 }
 0x531   :  { %1091 = shalt.err (!%p1088_p4)
}
 0x532   :  { %s1105_s24 = smov 128   ;;  %s1106_s0 = smov 8  }
 0x533   :  { %795 = dma.vmem_to_hbm [thread:$0]  %s790_s23, 512, %s1402_s3, [#allocation3], %s1105_s24, %s1105_s24, %s1106_s0  }
 0x534   :  { %1100 = dma.done.wait [#allocation3], 512  }
 0x535   :  { %1101 = vsyncadd [#allocation3], 4294966784 }
 0x536   :  { %799 = vsyncpa [#allocation3], 1 }

</bundles_post_ra>
